<compile_context>
chip_gen: v6e
topology: v6e:2x2x1
jax: 0.10.0
libtpu: 0.0.40
codegen_flags: <defaults>
</compile_context>

<pallas_src>
import functools

import jax
import jax.numpy as jnp
from jax.experimental import pallas as pl
from jax.experimental.pallas import tpu as pltpu


def _round_up(x: int, m: int) -> int:
    return ((x + m - 1) // m) * m


def actor_mlp_kernel(x_ref, w1_ref, b1_ref, w2_ref, b2_ref, w3_ref, b3_ref,
                     o_ref):
    """Fused 3-layer MLP + tanh head for one batch tile (all operands in VMEM).

    x_ref : (TB, S)   float             w1_ref: (S,  H1) bf16   b1_ref: (1, H1) f32
    w2_ref: (H1, H2)  bf16              b2_ref: (1, H2) f32
    w3_ref: (H2, Ap)  bf16 (lane-pad)   b3_ref: (1, Ap) f32
    o_ref : (TB, Ap)
    """
    mm_dtype = w1_ref.dtype  # bf16 matmul operands, f32 accumulation.
    x = x_ref[...].astype(mm_dtype)

    # Layer 1: Linear + ReLU (bias/ReLU in f32).
    h = jnp.dot(x, w1_ref[...], preferred_element_type=jnp.float32) + b1_ref[...]
    h = jnp.maximum(h, 0.0)

    # Layer 2: Linear + ReLU.
    h = jnp.dot(h.astype(mm_dtype), w2_ref[...],
                preferred_element_type=jnp.float32) + b2_ref[...]
    h = jnp.maximum(h, 0.0)

    # Layer 3: Linear (build_mlp drops the trailing ReLU) + tanh head (EUP, f32).
    h = jnp.dot(h.astype(mm_dtype), w3_ref[...],
                preferred_element_type=jnp.float32) + b3_ref[...]
    o_ref[...] = jnp.tanh(h).astype(o_ref.dtype)


@functools.partial(jax.jit, static_argnames=("block_batch",))
def actor_forward(state, w1, b1, w2, b2, w3, b3, *, block_batch=512):
    """tanh(MLP(state)) via a single batch-tiled, weight-resident pallas_call."""
    batch, state_dim = state.shape
    h1 = w1.shape[1]
    h2 = w2.shape[1]
    action_dim = w3.shape[1]
    out_dtype = state.dtype

    # Accept biases given as (H,) or (1, H).
    b1 = b1.reshape(1, -1)
    b2 = b2.reshape(1, -1)
    b3 = b3.reshape(1, -1)

    # ---- Lane-dense final layer: pad output columns up to a multiple of 128.
    a_pad = _round_up(max(action_dim, 128), 128)
    if a_pad != action_dim:
        w3_p = jnp.zeros((h2, a_pad), w3.dtype).at[:, :action_dim].set(w3)
        b3_p = jnp.zeros((1, a_pad), b3.dtype).at[:, :action_dim].set(b3)
    else:
        w3_p, b3_p = w3, b3

    # ---- Batch tiling: TB is a multiple of 8, capped at block_batch rows.
    tb = min(block_batch, _round_up(batch, 8))
    padded_batch = _round_up(batch, tb)
    if padded_batch != batch:
        state_p = jnp.zeros((padded_batch, state_dim), state.dtype).at[:batch].set(state)
    else:
        state_p = state

    # ---- Dtypes: bf16 matmul operands (weights), f32 biases / elementwise.
    mm_dtype = jnp.bfloat16
    w1_c = w1.astype(mm_dtype)
    w2_c = w2.astype(mm_dtype)
    w3_c = w3_p.astype(mm_dtype)
    b1_c = b1.astype(jnp.float32)
    b2_c = b2.astype(jnp.float32)
    b3_c = b3_p.astype(jnp.float32)

    grid = (padded_batch // tb,)

    def resident(shape):
        # Whole-array block; constant block index -> stays VMEM-resident
        # (no re-DMA across batch grid iterations).
        return pl.BlockSpec(shape, lambda i: (0, 0))

    flops = 2 * padded_batch * (state_dim * h1 + h1 * h2 + h2 * a_pad)
    weight_bytes = sum(int(a.size) * a.dtype.itemsize
                       for a in (w1_c, b1_c, w2_c, b2_c, w3_c, b3_c))
    stream_bytes = (int(state_p.size) * state_p.dtype.itemsize
                    + padded_batch * a_pad * jnp.dtype(out_dtype).itemsize)
    cost = pl.CostEstimate(
        flops=flops,
        transcendentals=padded_batch * a_pad,
        bytes_accessed=weight_bytes + stream_bytes,
    )

    out_padded = pl.pallas_call(
        actor_mlp_kernel,
        out_shape=jax.ShapeDtypeStruct((padded_batch, a_pad), out_dtype),
        grid=grid,
        in_specs=[
            pl.BlockSpec((tb, state_dim), lambda i: (i, 0)),
            resident(w1_c.shape), resident(b1_c.shape),
            resident(w2_c.shape), resident(b2_c.shape),
            resident(w3_c.shape), resident(b3_c.shape),
        ],
        out_specs=pl.BlockSpec((tb, a_pad), lambda i: (i, 0)),
        compiler_params=pltpu.CompilerParams(
            dimension_semantics=("parallel",),   # v7x: shard batch over 2 TCs.
            vmem_limit_bytes=32 * 1024 * 1024,   # fits v7x's 64 MiB VMEM.
        ),
        cost_estimate=cost,
    )(state_p, w1_c, b1_c, w2_c, b2_c, w3_c, b3_c)

    # Strip batch padding and lane padding.
    return out_padded[:batch, :action_dim]


def init_linear_params(key, in_features, out_features, dtype=jnp.float32):
    """Deterministic init mimicking PyTorch nn.Linear default (uniform +-1/sqrt(in))."""
    k_w, k_b = jax.random.split(key)
    bound = 1.0 / jnp.sqrt(jnp.asarray(in_features, dtype))
    # Stored as (in, out) so the kernel does x @ W (PyTorch stores (out, in)).
    w = jax.random.uniform(k_w, (in_features, out_features), dtype,
                           minval=-bound, maxval=bound)
    b = jax.random.uniform(k_b, (1, out_features), dtype,
                           minval=-bound, maxval=bound)
    return w, b


def reference_forward_f32(state, w1, b1, w2, b2, w3, b3):
    h = jnp.maximum(state @ w1 + b1, 0.0)
    h = jnp.maximum(h @ w2 + b2, 0.0)
    return jnp.tanh(h @ w3 + b3)


def reference_forward_bf16(state, w1, b1, w2, b2, w3, b3):
    """Emulates the kernel's bf16-operand / f32-accumulate numerics."""
    bf = jnp.bfloat16
    h = jnp.dot(state.astype(bf), w1.astype(bf),
                preferred_element_type=jnp.float32) + b1
    h = jnp.maximum(h, 0.0)
    h = jnp.dot(h.astype(bf), w2.astype(bf),
                preferred_element_type=jnp.float32) + b2
    h = jnp.maximum(h, 0.0)
    h = jnp.dot(h.astype(bf), w3.astype(bf),
                preferred_element_type=jnp.float32) + b3
    return jnp.tanh(h)


if __name__ == "__main__":
    # Small shapes consistent with Actor(net_dims=[32, 32], state_dim=16, action_dim=4)
    batch = 2
    state_dim = 16
    net_dims = [32, 32]
    action_dim = 4

    key = jax.random.PRNGKey(0)
    k_state, k1, k2, k3 = jax.random.split(key, 4)

    state = jax.random.normal(k_state, (batch, state_dim), jnp.float32)
    w1, b1 = init_linear_params(k1, state_dim, net_dims[0])
    w2, b2 = init_linear_params(k2, net_dims[0], net_dims[1])
    w3, b3 = init_linear_params(k3, net_dims[1], action_dim)

    action = actor_forward(state, w1, b1, w2, b2, w3, b3)
    action = jax.block_until_ready(action)
    assert action.shape == (batch, action_dim)

    # Tight check against a reference using the same bf16/f32 numerics.
    exp_bf16 = reference_forward_bf16(state, w1, b1, w2, b2, w3, b3)
    assert jnp.allclose(action, exp_bf16, atol=2e-3, rtol=2e-3), (
        "Pallas kernel output mismatch vs bf16-emulating JAX reference")

    # Sanity check against pure-f32 PyTorch-equivalent math (looser tolerance,
    # since matmul operands are bf16 in the kernel).
    exp_f32 = reference_forward_f32(state, w1, b1, w2, b2, w3, b3)
    assert jnp.allclose(action, exp_f32, atol=5e-2, rtol=5e-2), (
        "Pallas kernel output mismatch vs f32 JAX reference")

    # TODO(synk): Actor.get_action's Normal sampling / clip is left to plain JAX
    # (could be fused via pltpu.prng_seed + pltpu.stateful_normal if desired).
    print("KERNEL_OK")
</pallas_src>

<mosaic_0001>
module attributes {stable_mosaic.version = 11 : i64} {
  func.func @actor_mlp_kernel(%arg0: i32, %arg1: memref<8x16xf32, #tpu.memory_space<vmem>>, %arg2: memref<16x32xbf16, #tpu.memory_space<vmem>>, %arg3: memref<1x32xf32, #tpu.memory_space<vmem>>, %arg4: memref<32x32xbf16, #tpu.memory_space<vmem>>, %arg5: memref<1x32xf32, #tpu.memory_space<vmem>>, %arg6: memref<32x128xbf16, #tpu.memory_space<vmem>>, %arg7: memref<1x128xf32, #tpu.memory_space<vmem>>, %arg8: memref<8x128xf32, #tpu.memory_space<vmem>>) attributes {dimension_semantics = [#tpu.dimension_semantics<parallel>], iteration_bounds = array<i64: 1>, scalar_prefetch = 0 : i64, scratch_operands = 0 : i64, tpu.core_type = #tpu.core_type<tc>, window_params = [{transform_indices = @transform_0, window_bounds = array<i64: 8, 16>}, {pipeline_mode = #tpu.pipeline_mode<synchronous>, transform_indices = @transform_1, window_bounds = array<i64: 16, 32>}, {pipeline_mode = #tpu.pipeline_mode<synchronous>, transform_indices = @transform_2, window_bounds = array<i64: 1, 32>}, {pipeline_mode = #tpu.pipeline_mode<synchronous>, transform_indices = @transform_3, window_bounds = array<i64: 32, 32>}, {pipeline_mode = #tpu.pipeline_mode<synchronous>, transform_indices = @transform_4, window_bounds = array<i64: 1, 32>}, {pipeline_mode = #tpu.pipeline_mode<synchronous>, transform_indices = @transform_5, window_bounds = array<i64: 32, 128>}, {pipeline_mode = #tpu.pipeline_mode<synchronous>, transform_indices = @transform_6, window_bounds = array<i64: 1, 128>}, {transform_indices = @transform_7, window_bounds = array<i64: 8, 128>}]} {
    %c0 = arith.constant 0 : index
    %c0_0 = arith.constant 0 : index
    %0 = vector.load %arg1[%c0, %c0_0] : memref<8x16xf32, #tpu.memory_space<vmem>>, vector<8x16xf32>
    %1 = arith.truncf %0 : vector<8x16xf32> to vector<8x16xbf16>
    %c0_1 = arith.constant 0 : index
    %c0_2 = arith.constant 0 : index
    %2 = vector.load %arg2[%c0_1, %c0_2] : memref<16x32xbf16, #tpu.memory_space<vmem>>, vector<16x32xbf16>
    %cst = arith.constant dense<0.000000e+00> : vector<8x32xf32>
    %3 = tpu.matmul %1, %2, %cst {dimension_numbers = #tpu.dot_dimension_numbers<[1], [0], [0], [1], [0, 0, 1, 1], [], []>} : vector<8x16xbf16>, vector<16x32xbf16>, vector<8x32xf32> -> vector<8x32xf32>
    %c0_3 = arith.constant 0 : index
    %c0_4 = arith.constant 0 : index
    %4 = vector.load %arg3[%c0_3, %c0_4] : memref<1x32xf32, #tpu.memory_space<vmem>>, vector<1x32xf32>
    %5 = vector.broadcast %4 : vector<1x32xf32> to vector<8x32xf32>
    %6 = arith.addf %3, %5 : vector<8x32xf32>
    %cst_5 = arith.constant 0.000000e+00 : f32
    %7 = vector.broadcast %cst_5 : f32 to vector<8x32xf32>
    %8 = arith.maximumf %6, %7 : vector<8x32xf32>
    %9 = arith.truncf %8 : vector<8x32xf32> to vector<8x32xbf16>
    %c0_6 = arith.constant 0 : index
    %c0_7 = arith.constant 0 : index
    %10 = vector.load %arg4[%c0_6, %c0_7] : memref<32x32xbf16, #tpu.memory_space<vmem>>, vector<32x32xbf16>
    %cst_8 = arith.constant dense<0.000000e+00> : vector<8x32xf32>
    %11 = tpu.matmul %9, %10, %cst_8 {dimension_numbers = #tpu.dot_dimension_numbers<[1], [0], [0], [1], [0, 0, 1, 1], [], []>} : vector<8x32xbf16>, vector<32x32xbf16>, vector<8x32xf32> -> vector<8x32xf32>
    %c0_9 = arith.constant 0 : index
    %c0_10 = arith.constant 0 : index
    %12 = vector.load %arg5[%c0_9, %c0_10] : memref<1x32xf32, #tpu.memory_space<vmem>>, vector<1x32xf32>
    %13 = vector.broadcast %12 : vector<1x32xf32> to vector<8x32xf32>
    %14 = arith.addf %11, %13 : vector<8x32xf32>
    %cst_11 = arith.constant 0.000000e+00 : f32
    %15 = vector.broadcast %cst_11 : f32 to vector<8x32xf32>
    %16 = arith.maximumf %14, %15 : vector<8x32xf32>
    %17 = arith.truncf %16 : vector<8x32xf32> to vector<8x32xbf16>
    %c0_12 = arith.constant 0 : index
    %c0_13 = arith.constant 0 : index
    %18 = vector.load %arg6[%c0_12, %c0_13] : memref<32x128xbf16, #tpu.memory_space<vmem>>, vector<32x128xbf16>
    %cst_14 = arith.constant dense<0.000000e+00> : vector<8x128xf32>
    %19 = tpu.matmul %17, %18, %cst_14 {dimension_numbers = #tpu.dot_dimension_numbers<[1], [0], [0], [1], [0, 0, 1, 1], [], []>} : vector<8x32xbf16>, vector<32x128xbf16>, vector<8x128xf32> -> vector<8x128xf32>
    %c0_15 = arith.constant 0 : index
    %c0_16 = arith.constant 0 : index
    %20 = vector.load %arg7[%c0_15, %c0_16] : memref<1x128xf32, #tpu.memory_space<vmem>>, vector<1x128xf32>
    %21 = vector.broadcast %20 : vector<1x128xf32> to vector<8x128xf32>
    %22 = arith.addf %19, %21 : vector<8x128xf32>
    %23 = math.tanh %22 : vector<8x128xf32>
    %c0_17 = arith.constant 0 : index
    %c0_18 = arith.constant 0 : index
    %24 = vector.load %arg8[%c0_17, %c0_18] : memref<8x128xf32, #tpu.memory_space<vmem>>, vector<8x128xf32>
    tpu.vector_store %arg8[%c0_17, %c0_18], %23 {strides = array<i32>} : memref<8x128xf32, #tpu.memory_space<vmem>>, vector<8x128xf32>,
    return
  }
  func.func @transform_0(%arg0: i32) -> (i32, i32) {
    %c0_i32 = arith.constant 0 : i32
    %c0_i32_0 = arith.constant 0 : i32
    return %arg0, %c0_i32 : i32, i32
  }
  func.func @transform_1(%arg0: i32) -> (i32, i32) {
    %c0_i32 = arith.constant 0 : i32
    %c0_i32_0 = arith.constant 0 : i32
    %c0_i32_1 = arith.constant 0 : i32
    return %c0_i32, %c0_i32_0 : i32, i32
  }
  func.func @transform_2(%arg0: i32) -> (i32, i32) {
    %c0_i32 = arith.constant 0 : i32
    %c0_i32_0 = arith.constant 0 : i32
    %c0_i32_1 = arith.constant 0 : i32
    return %c0_i32, %c0_i32_0 : i32, i32
  }
  func.func @transform_3(%arg0: i32) -> (i32, i32) {
    %c0_i32 = arith.constant 0 : i32
    %c0_i32_0 = arith.constant 0 : i32
    %c0_i32_1 = arith.constant 0 : i32
    return %c0_i32, %c0_i32_0 : i32, i32
  }
  func.func @transform_4(%arg0: i32) -> (i32, i32) {
    %c0_i32 = arith.constant 0 : i32
    %c0_i32_0 = arith.constant 0 : i32
    %c0_i32_1 = arith.constant 0 : i32
    return %c0_i32, %c0_i32_0 : i32, i32
  }
  func.func @transform_5(%arg0: i32) -> (i32, i32) {
    %c0_i32 = arith.constant 0 : i32
    %c0_i32_0 = arith.constant 0 : i32
    %c0_i32_1 = arith.constant 0 : i32
    return %c0_i32, %c0_i32_0 : i32, i32
  }
  func.func @transform_6(%arg0: i32) -> (i32, i32) {
    %c0_i32 = arith.constant 0 : i32
    %c0_i32_0 = arith.constant 0 : i32
    %c0_i32_1 = arith.constant 0 : i32
    return %c0_i32, %c0_i32_0 : i32, i32
  }
  func.func @transform_7(%arg0: i32) -> (i32, i32) {
    %c0_i32 = arith.constant 0 : i32
    %c0_i32_0 = arith.constant 0 : i32
    return %arg0, %c0_i32 : i32, i32
  }
}

</mosaic_0001>

<bundles_post_ra>
// kernel: actor_forward.1
= control target key start
LH: loop header
LB: loop body
LE: loop exit
PB: predicated region body
PF: predicated region fallthrough
CT: control target
= control target key end

     0   :  { %v281_v0 = vmov 0.0   ;;  %vm282_vm0 = vmmov 0   ;;  %vm44_vm1 = vcmask 130048   ;;  %vm113_vm2 = vcmask 261120   ;;  %s353_s1 = inlined_call_operand.vmem [shape: bf16[16,32], index: 1, kind: input, shape index: {}]   ;;  %s354_s0 = inlined_call_operand.vmem [shape: f32[8,16], index: 0, kind: input, shape index: {}]   ;;  %s355_s3 = inlined_call_operand.vmem [shape: bf16[32,32], index: 3, kind: input, shape index: {}]   ;;  %s356_s5 = inlined_call_operand.vmem [shape: bf16[32,128], index: 5, kind: input, shape index: {}]   ;;  %s357_s2 = inlined_call_operand.vmem [shape: f32[1,32], index: 2, kind: input, shape index: {}]   ;;  %s358_s4 = inlined_call_operand.vmem [shape: f32[1,32], index: 4, kind: input, shape index: {}]   ;;  %s359_s6 = inlined_call_operand.vmem [shape: f32[1,128], index: 6, kind: input, shape index: {}]   ;;  %s360_s7 = inlined_call_operand.vmem [shape: f32[8,128], index: 7, kind: output, shape index: {}]  }
   0x1   :  { %250 = vmatprep.subr.bf16.mxu0 %v281_v0  ;;  %v274_v1 = vld [vmem:[%s353_s1] sm:$0xff]   ;;  %252 = vmatprep.mubr.msk.bf16.mxu0 %vm282_vm0, %v281_v0  ;;  %v275_v4 = vld [vmem:[%s355_s3 + $0x8] sm:$0xff]  }
   0x2   :  { %v27_v2 = vld [vmem:[%s354_s0] sm:$0xff]  ;;  %256 = vmatprep.subr.bf16.mxu1 %v281_v0  ;;  %260 = vmatprep.mubr.msk.bf16.mxu1 %vm282_vm0, %v281_v0  ;;  %v277_v6 = vld [vmem:[%s356_s5 + $0x8] sm:$0xff]  }
   0x3   :  { %251 = vmatpush3.bf16.msra.mxu0 %v274_v1  ;;  %v28_v3 = vpack.c.bf16 %v27_v2, %v27_v2  ;;  %257 = vmatpush3.bf16.msra.mxu1 %v275_v4  ;;  %v276_v5 = vld [vmem:[%s355_s3] sm:$0xff]  }
   0x4   :  { %264 = vmatprep.subr.bf16.mxu0 %v281_v0  ;;  %258 = vmatprep.subr.bf16.mxu1 %v281_v0  ;;  %v231_v7 = vld [vmem:[%s357_s2] ss:$0 sm:$0xff] }
   0x5   :  { %v278_v15 = vld [vmem:[%s356_s5] sm:$0xff]  }
   0x6   :  { %253 = vmatmul.mubr.msk.bf16.vlgmr.msra.gmra.mxu0 %vm44_vm1, %v28_v3  ;;  %v234_v16 = vld [vmem:[%s358_s4] ss:$0 sm:$0xff] }
   0x7   :  { %268 = vmatprep.mubr.msk.bf16.mxu0 %vm282_vm0, %v281_v0  ;;  %259 = vmatpush3.bf16.msra.mxu1 %v276_v5  ;;  %v238_v24 = vld [vmem:[%s359_s6] ss:$0 sm:$0xff] }
   0x8   :  { %265 = vmatpush3.bf16.msra.mxu0 %v277_v6 }
   0x9   :  { %266 = vmatprep.subr.bf16.mxu0 %v281_v0 }
   0xc   :  { %267 = vmatpush3.bf16.msra.mxu0 %v278_v15 }
  0xc6   :  { %v82_v8 = vpop.f32.mrf.mxu0 }
  0xc7   :  { %v83_v9 = vadd.f32 %v231_v7, %v82_v8 }
  0xc8   :  { %v254_v10 = vpop.f32.mrf.mxu0 }
  0xc9   :  { %v88_v11 = vmax.f32 %v83_v9, 0.0 }
  0xca   :  { %v85_v12 = vpop.f32.mrf.mxu0 }
  0xcb   :  { %v89_v13 = vpack.c.bf16 %v88_v11, %v88_v11 }
  0xcc   :  { %v255_v14 = vpop.f32.mrf.mxu0 }
  0xcd   :  { %261 = vmatmul.mubr.msk.bf16.vlgmr.msra.gmra.mxu1 %vm113_vm2, %v89_v13 }
 0x18d   :  { %v151_v17 = vpop.f32.mrf.mxu1 }
 0x18e   :  { %v152_v18 = vadd.f32 %v234_v16, %v151_v17 }
 0x18f   :  { %v262_v19 = vpop.f32.mrf.mxu1 }
 0x190   :  { %v157_v20 = vmax.f32 %v152_v18, 0.0 }
 0x191   :  { %v154_v21 = vpop.f32.mrf.mxu1 }
 0x192   :  { %v158_v22 = vpack.c.bf16 %v157_v20, %v157_v20 }
 0x193   :  { %v263_v23 = vpop.f32.mrf.mxu1 }
 0x194   :  { %269 = vmatmul.mubr.msk.bf16.vlgmr.msra.gmra.mxu0 %vm113_vm2, %v158_v22 }
 0x254   :  { %v219_v25 = vpop.f32.mrf.mxu0 }
 0x255   :  { %v220_v26 = vadd.f32 %v238_v24, %v219_v25 }
 0x256   :  { %v270_v27 = vpop.f32.mrf.mxu0 }
 0x257   :  { %279 = vtanh.f32 %v220_v26 }
 0x258   :  { %v222_v28 = vpop.f32.mrf.mxu0 }
 0x25a   :  { %v271_v29 = vpop.f32.mrf.mxu0 }
 0x264   :  { %v280_v30 = vpop.eup %279 }
 0x265   :  { %226 = vst [vmem:[%s360_s7] sm:$0xff] %v280_v30 }

</bundles_post_ra>
